<compile_context>
chip_gen: v7x
topology: tpu7x:2x2x1
jax: 0.10.0
libtpu: 0.0.40
codegen_flags: <defaults>
</compile_context>

<pallas_src>
import functools

import jax
import jax.numpy as jnp
from jax import lax
from jax.experimental import pallas as pl
from jax.experimental.pallas import tpu as pltpu


# ----------------------------------------------------------------------------
# Kernel 1: per-batch softmax over the flattened spatial axis.
# ----------------------------------------------------------------------------
def _softmax_kernel(p_ref, w_ref, *, scale):
    """p_ref: (1, tk, N) probs rows; w_ref: (1, tk, N) weights in feats dtype."""
    p = p_ref[0].astype(jnp.float32)                       # (tk, N)
    if scale != 1.0:
        p = p * scale
    m = jnp.max(p, axis=-1, keepdims=True)                 # (tk, 1)
    e = jnp.exp(p - m)                                     # (tk, N)
    s = jnp.sum(e, axis=-1, keepdims=True)                 # (tk, 1)
    # Exact division: this kernel is off the hot path, so keep f32-softmax
    # parity with the PyTorch module instead of the approx reciprocal.
    w_ref[0] = (e / s).astype(w_ref.dtype)


# ----------------------------------------------------------------------------
# Kernel 2: streaming gather  ctx[b,c,k] = sum_n feats[b,c,n] * w[b,k,n]
# ----------------------------------------------------------------------------
def _gather_kernel(w_ref, f_ref, o_ref, acc_ref):
    """One grid step (batch b, C-tile c, N-chunk n).

    w_ref:   (1, K, tn)  softmax-weight chunk (lane-dense in N)
    f_ref:   (1, tc, tn) feats chunk, native (C, N) layout
    o_ref:   (1, tc, K)  context output tile (resident across n)
    acc_ref: (tc, K)     f32 accumulator (VMEM scratch)
    """
    n = pl.program_id(2)

    @pl.when(n == 0)
    def _init():
        acc_ref[...] = jnp.zeros_like(acc_ref)

    # One MXU contraction per chunk, contracting the shared last (lane) dim of
    # both operands (transposed-RHS path, same as flash attention's q.kT), so
    # no relayout lives inside the hot loop.
    acc_ref[...] += lax.dot_general(
        f_ref[0], w_ref[0],                                # (tc, tn) x (K, tn)
        dimension_numbers=(((1,), (1,)), ((), ())),
        preferred_element_type=jnp.float32)                # -> (tc, K) f32

    @pl.when(n == pl.num_programs(2) - 1)
    def _finalize():
        o_ref[0] = acc_ref[...].astype(o_ref.dtype)


# ----------------------------------------------------------------------------
# Helpers
# ----------------------------------------------------------------------------
def _round_up(x, m):
    return ((x + m - 1) // m) * m


def _pick_tile(total, limit, granule):
    """Pick a block size for an axis of extent `total`.

    Preference order:
      1) the largest divisor of `total` that is a multiple of `granule` and
         is <= `limit`
      2) the smallest multiple-of-`granule` divisor (closest overshoot of the
         budget, instead of silently jumping to a full-extent block)
      3) `total` itself (full-extent block is always legal).
    """
    if total <= limit:
        return total
    best_le = None
    best_gt = None
    d = granule
    while d < total:
        if total % d == 0:
            if d <= limit:
                best_le = d
            elif best_gt is None:
                best_gt = d
        d += granule
    if best_le is not None:
        return best_le
    if best_gt is not None:
        return best_gt
    return total


def _vmem_capacity_bytes():
    """Physical VMEM per core, or None if it cannot be queried."""
    try:
        info = pltpu.get_tpu_info()
        cap = int(getattr(info, "vmem_capacity_bytes", 0))
        return cap if cap > 0 else None
    except Exception:
        return None


def _clamp_vmem(request, cap):
    # Never ask for more than ~75% of physical VMEM: leaves headroom for
    # Mosaic internal scratch and layout padding (48 MiB on v7x, 96 MiB on
    # v5e/v6e instead of the whole chip).
    hi = max(32 << 20, int(0.75 * cap))
    return int(min(max(int(request), 32 << 20), hi))


def _bilinear_resize_align_corners(x, out_h, out_w):
    """F.interpolate(..., mode='bilinear', align_corners=True) for NCHW input."""
    B, K, Hin, Win = x.shape
    if Hin == out_h and Win == out_w:
        return x

    def src_coords(n_in, n_out):
        if n_out == 1:
            return jnp.zeros((1,), jnp.float32)
        return jnp.arange(n_out, dtype=jnp.float32) * ((n_in - 1) / (n_out - 1))

    ys = src_coords(Hin, out_h)
    xs = src_coords(Win, out_w)
    y0 = jnp.floor(ys).astype(jnp.int32)
    x0 = jnp.floor(xs).astype(jnp.int32)
    y1 = jnp.minimum(y0 + 1, Hin - 1)
    x1 = jnp.minimum(x0 + 1, Win - 1)
    wy = (ys - y0.astype(jnp.float32))[None, None, :, None]
    wx = (xs - x0.astype(jnp.float32))[None, None, None, :]

    top = x[:, :, y0, :]
    bot = x[:, :, y1, :]
    vert = top * (1.0 - wy) + bot * wy                     # (B, K, out_h, Win)
    left = vert[:, :, :, x0]
    right = vert[:, :, :, x1]
    return left * (1.0 - wx) + right * wx                  # (B, K, out_h, out_w)


# ----------------------------------------------------------------------------
# Wrapper
# ----------------------------------------------------------------------------
def spatial_gather(feats, probs, scale=1.0, *, block_n=None, block_c=None):
    """feats: (B, C, H, W), probs: (B, K, Hp, Wp) -> (B, C, K, 1)."""
    B, C, H, W = feats.shape
    K = probs.shape[1]
    N = H * W

    # Glue: bilinear upsample of probs (gather-heavy, stays in plain JAX).
    # TODO(synk): bilinear align_corners interpolation is left to XLA; no clean
    # Pallas gather for it.
    probs_r = _bilinear_resize_align_corners(probs, H, W).reshape(B, K, N)
    feats_r = feats.reshape(B, C, N)                       # native layout, no transpose

    feats_bytes = jnp.dtype(feats.dtype).itemsize
    probs_bytes = jnp.dtype(probs_r.dtype).itemsize
    w_dtype = feats.dtype

    cap = _vmem_capacity_bytes()
    detected = cap is not None
    vmem_cap = cap if detected else (64 << 20)             # conservative fallback

    # Per-generation feats-tile byte budget: big tiles amortize the ~0.35 us
    # per-grid-step overhead and keep the kernel on the HBM roofline.
    feats_tile_budget = (4 << 20) if vmem_cap <= (64 << 20) else (8 << 20)

    # C tile.  bf16 packs 16 rows per sublane tile -> require %16 when split.
    c_granule = 16 if feats_bytes < 4 else 8
    if block_c is not None:
        tc = block_c
    else:
        tc = C
        # v7x (64 MiB VMEM, 2 TensorCores/chip): at B == 1 split C so the
        # "parallel" c axis gives both cores independent feats streams.
        if (detected and vmem_cap <= (64 << 20) and B == 1
                and C % (2 * c_granule) == 0):
            tc = C // 2
    assert C % tc == 0 and (tc == C or tc % c_granule == 0), (C, tc, c_granule)

    # N tile: largest 128-multiple divisor of N within the byte budget.
    if block_n is not None:
        tn = block_n
    else:
        tn_cap = (feats_tile_budget // max(1, tc * feats_bytes)) // 128 * 128
        tn_cap = max(128, min(8192, tn_cap))
        tn = _pick_tile(N, tn_cap, 128)
    assert N % tn == 0 and (tn == N or tn % 128 == 0), (N, tn)
    n_steps = N // tn

    # --- Kernel 1: softmax weights (B, K, N) in feats dtype, once per batch ---
    tk_cap = max(8, ((2 << 20) // max(1, N * 4)) // 8 * 8)
    tk = _pick_tile(K, tk_cap, 8)
    assert K % tk == 0 and (tk == K or tk % 8 == 0), (K, tk)

    sm_est = (2 * tk * N * probs_bytes                     # probs blocks (2 bufs)
              + 2 * tk * N * feats_bytes                   # weight blocks (2 bufs)
              + 4 * tk * N * 4)                            # f32 temporaries
    weights = pl.pallas_call(
        functools.partial(_softmax_kernel, scale=float(scale)),
        out_shape=jax.ShapeDtypeStruct((B, K, N), w_dtype),
        grid_spec=pltpu.PrefetchScalarGridSpec(
            num_scalar_prefetch=0,
            grid=(B, K // tk),
            in_specs=[pl.BlockSpec((1, tk, N), lambda b, k: (b, k, 0))],
            out_specs=pl.BlockSpec((1, tk, N), lambda b, k: (b, k, 0)),
        ),
        compiler_params=pltpu.CompilerParams(
            dimension_semantics=("parallel", "parallel"),
            vmem_limit_bytes=_clamp_vmem(2 * sm_est, vmem_cap),
        ),
    )(probs_r)                                             # (B, K, N)

    # --- Kernel 2: streaming context gather ---
    feats_bufs = 3 if n_steps >= 3 else 2
    est = (feats_bufs * tc * tn * feats_bytes              # feats stream
           + 2 * _round_up(K, 32) * tn * feats_bytes       # weight chunks (sublane pad)
           + 2 * tc * 128 * feats_bytes                    # out tile (K -> 128 lanes)
           + tc * 128 * 4)                                 # f32 accumulator (padded)
    vmem_limit = _clamp_vmem(2 * est, vmem_cap)

    feats_spec_kwargs = {}
    if n_steps >= 3:
        # 3-deep feats buffering rides the stream over batch / C-tile boundaries.
        feats_spec_kwargs["pipeline_mode"] = pl.Buffered(3)

    ctx = pl.pallas_call(
        _gather_kernel,
        out_shape=jax.ShapeDtypeStruct((B, C, K), feats.dtype),
        grid_spec=pltpu.PrefetchScalarGridSpec(
            num_scalar_prefetch=0,
            grid=(B, C // tc, n_steps),
            in_specs=[
                # softmax-weight chunks, lane-dense in N.
                pl.BlockSpec((1, K, tn), lambda b, c, n: (b, 0, n)),
                # feats: streamed (1, tc, tn) tiles in native (C, N) layout.
                pl.BlockSpec((1, tc, tn), lambda b, c, n: (b, c, n),
                             **feats_spec_kwargs),
            ],
            out_specs=pl.BlockSpec((1, tc, K), lambda b, c, n: (b, c, 0)),
            scratch_shapes=[pltpu.VMEM((tc, K), jnp.float32)],
        ),
        compiler_params=pltpu.CompilerParams(
            dimension_semantics=("parallel", "parallel", "arbitrary"),
            vmem_limit_bytes=vmem_limit,
        ),
    )(weights, feats_r)                                    # (B, C, K)

    return ctx[..., None]                                  # (B, C, K, 1)


# ----------------------------------------------------------------------------
# Reference & test
# ----------------------------------------------------------------------------
def _reference(feats, probs, scale=1.0):
    B, C, H, W = feats.shape
    p = _bilinear_resize_align_corners(probs, H, W).reshape(B, probs.shape[1], -1)
    f = jnp.transpose(feats.reshape(B, C, -1), (0, 2, 1))
    w = jax.nn.softmax(scale * p, axis=2)
    ctx = jnp.einsum("bkn,bnc->bkc", w, f)
    return jnp.transpose(ctx, (0, 2, 1))[..., None]


if __name__ == "__main__":
    key = jax.random.PRNGKey(0)
    k1, k2 = jax.random.split(key)

    B, C, H, W = 2, 16, 32, 32     # feats
    K, Hp, Wp = 8, 16, 16          # probs (coarser -> exercises bilinear resize)

    feats = jax.random.normal(k1, (B, C, H, W), dtype=jnp.float32)
    probs = jax.random.normal(k2, (B, K, Hp, Wp), dtype=jnp.float32)

    ref = _reference(feats, probs, scale=1.0)

    # Explicit small tiles: exercises the multi-step N reduction (8 steps ->
    # Buffered(3) feats stream) and the C split used for the v7x core split.
    out = spatial_gather(feats, probs, scale=1.0, block_n=128, block_c=8)
    out = jax.block_until_ready(out)
    assert out.shape == (B, C, K, 1), out.shape
    assert jnp.allclose(out, ref, atol=2e-3, rtol=2e-3), (
        float(jnp.max(jnp.abs(out - ref))))

    # Default (auto-tiled) path.
    out2 = jax.block_until_ready(spatial_gather(feats, probs, scale=1.0))
    assert jnp.allclose(out2, ref, atol=2e-3, rtol=2e-3), (
        float(jnp.max(jnp.abs(out2 - ref))))

    # bf16 feats path (weights cached in bf16, bf16 MXU with f32 accumulator).
    feats_bf = feats.astype(jnp.bfloat16)
    ref_bf = _reference(feats_bf.astype(jnp.float32), probs, scale=1.0)
    out3 = jax.block_until_ready(
        spatial_gather(feats_bf, probs, scale=1.0, block_n=256, block_c=16))
    assert jnp.allclose(out3.astype(jnp.float32), ref_bf, atol=2e-2, rtol=2e-2), (
        float(jnp.max(jnp.abs(out3.astype(jnp.float32) - ref_bf))))

    print("KERNEL_OK")
</pallas_src>

<mosaic_0001>
module attributes {stable_mosaic.version = 11 : i64} {
  func.func @_softmax_kernel(%arg0: i32, %arg1: i32, %arg2: memref<1x8x1024xf32, #tpu.memory_space<vmem>>, %arg3: memref<1x8x1024xf32, #tpu.memory_space<vmem>>) attributes {dimension_semantics = [#tpu.dimension_semantics<parallel>, #tpu.dimension_semantics<parallel>], iteration_bounds = array<i64: 2, 1>, scalar_prefetch = 0 : i64, scratch_operands = 0 : i64, tpu.core_type = #tpu.core_type<tc>, window_params = [{transform_indices = @transform_0, window_bounds = array<i64: 1, 8, 1024>}, {transform_indices = @transform_1, window_bounds = array<i64: 1, 8, 1024>}]} {
    %c0 = arith.constant 0 : index
    %c0_0 = arith.constant 0 : index
    %c0_1 = arith.constant 0 : index
    %0 = vector.load %arg2[%c0, %c0_0, %c0_1] : memref<1x8x1024xf32, #tpu.memory_space<vmem>>, vector<1x8x1024xf32>
    %1 = vector.shape_cast %0 : vector<1x8x1024xf32> to vector<8x1024xf32>
    %cst = arith.constant dense<0xFF800000> : vector<8xf32>
    %2 = vector.multi_reduction <maximumf>, %1, %cst [1] : vector<8x1024xf32> to vector<8xf32>
    %3 = vector.shape_cast %2 : vector<8xf32> to vector<8x1xf32>
    %4 = vector.broadcast %3 : vector<8x1xf32> to vector<8x1024xf32>
    %5 = arith.subf %1, %4 : vector<8x1024xf32>
    %6 = math.exp %5 : vector<8x1024xf32>
    %cst_2 = arith.constant dense<0.000000e+00> : vector<8xf32>
    %7 = vector.multi_reduction <add>, %6, %cst_2 [1] : vector<8x1024xf32> to vector<8xf32>
    %8 = vector.shape_cast %7 : vector<8xf32> to vector<8x1xf32>
    %9 = vector.broadcast %8 : vector<8x1xf32> to vector<8x1024xf32>
    %10 = arith.divf %6, %9 : vector<8x1024xf32>
    %c0_3 = arith.constant 0 : index
    %c0_4 = arith.constant 0 : index
    %c0_5 = arith.constant 0 : index
    %11 = vector.load %arg3[%c0_3, %c0_4, %c0_5] : memref<1x8x1024xf32, #tpu.memory_space<vmem>>, vector<1x8x1024xf32>
    %12 = vector.shape_cast %11 : vector<1x8x1024xf32> to vector<8x1024xf32>
    %13 = vector.shape_cast %10 : vector<8x1024xf32> to vector<1x8x1024xf32>
    tpu.vector_store %arg3[%c0_3, %c0_4, %c0_5], %13 {strides = array<i32>} : memref<1x8x1024xf32, #tpu.memory_space<vmem>>, vector<1x8x1024xf32>,
    return
  }
  func.func @transform_0(%arg0: i32, %arg1: i32) -> (i32, i32, i32) {
    %c0_i32 = arith.constant 0 : i32
    %c0_i32_0 = arith.constant 0 : i32
    return %arg0, %arg1, %c0_i32 : i32, i32, i32
  }
  func.func @transform_1(%arg0: i32, %arg1: i32) -> (i32, i32, i32) {
    %c0_i32 = arith.constant 0 : i32
    %c0_i32_0 = arith.constant 0 : i32
    return %arg0, %arg1, %c0_i32 : i32, i32, i32
  }
}

</mosaic_0001>

<bundles_post_ra>
// kernel: tpu_custom_call.1
= control target key start
LH: loop header
LB: loop body
LE: loop exit
PB: predicated region body
PF: predicated region fallthrough
CT: control target
= control target key end

     0   :  { %6 = vsyncpa [#allocation3], 0  ;;  %s718_s0 = inlined_call_operand.hbm [shape: f32[2,8,1024], index: 0, kind: input, shape index: {}]   ;;  %s719_s1 = inlined_call_operand.hbm [shape: f32[2,8,1024], index: 1, kind: output, shape index: {}]  }
   0x1   :  { %8 = vsyncpa [#allocation3 + $0x1], 0 }
   0x2   :  { %9 = vsyncpa [#allocation4], 0 }
   0x3   :  { %11 = vsyncpa [#allocation4 + $0x1], 0  ;;  %s542_s6 = smov 0   ;;  %s544_s7 = smov 0  }
   0x4   :  { %s546_s8 = smov 0   ;;  %s548_s9 = smov 0  }
   0x5   :  { %s550_s10 = smov 0   ;;  %s552_s11 = smov 0  }
   0x6 LB: > { %s319_s12 = sadd.s32 4294967295, %s528_s11   ;;  %s320_s13 = sadd.s32 4294967294, %s528_s11   ;;  %s528_s11 = sphi %s552_s11, %s17_s11   ;;  %s524_s10 = sphi %s550_s10, %s735_s10   ;;  %s520_s9 = sphi %s548_s9, %s734_s9   ;;  %s516_s8 = sphi %s546_s8, %s733_s8   ;;  %s512_s7 = sphi %s544_s7, %s732_s7   ;;  %s508_s6 = sphi %s542_s6, %s731_s6  }
   0x7   : > { %s29_s14 = sadd.s32 1, %s524_s10  ;;  %s38_s15 = sadd.s32 1, %s516_s8 }
   0x8   : > { %p31_p0 = scmp.ge.s32.totalorder %s29_s14, 2  ;;  %p45_p1 = scmp.ne.s32.totalorder %s516_s8, %s512_s7 }
   0x9   : > { %p46_p2 = scmp.eq.s32.totalorder %s528_s11, 0  ;;  %p51_p3 = scmp.ne.s32.totalorder %s512_s7, %s508_s6 }
   0xa   : > { %s737_s14 = smov (%p31_p0, %s29_s14), 0  ;;  %p52_p5 = scmp.eq.s32.totalorder %s319_s12, 0 }
   0xb   : > { %p583_p4 = por %p46_p2, %p45_p1  ;;  %s33_s17 = ssub.s32 %s524_s10, %s737_s14 }
   0xc   : > { %p77_p6 = scmp.eq.s32.totalorder %s319_s12, 1  ;;  %p36_p7 = scmp.eq.s32.totalorder %s33_s17, 0 }
   0xd   : > { %p589_p8 = por %p52_p5, %p51_p3  ;;  %p83_p10 = scmp.eq.s32.totalorder %s320_s13, 1 }
   0xe   : > { %p593_p9 = por %p77_p6, %p45_p1  ;;  %p348_p13 = scmp.lt.s32.totalorder %s528_s11, 2 }
   0xf   : > { %s598_s20 = scalar_select %p36_p7, %s516_s8, %s38_s15  }
  0x10   : > { %s723_s19 = scalar_select %p593_p9, 1, 0 }
  0x11   : > { %p600_p11 = por %p83_p10, %p51_p3  ;;  %s103_s22 = sand.u32 1, %s516_s8  }
  0x12   : > { %s323_s23 = sshll.u32 %s103_s22, 6  ;;  %s334_s24 = sshll.u32 %s524_s10, 10 }
  0x13   : > { %s724_s21 = scalar_select %p600_p11, 1, 0 }
  0x14   : > { %s611_s27 = scalar_lea.hbm %s718_s0, %s334_s24  ;;  %s107_s28 = scalar_lea.vmem [#allocation2], %s323_s23 }
  0x15   : > { %s117_s29 = sshll.u32 %s107_s28, 4  ;;  %p617_p0 = pnand %p348_p13, %p583_p4  ;;  %s613_s29 = int_to_ptr.vmem [resolvable:$true] %s117_s29 }
  0x16   : > { %s104_s2 = scalar_lea.sflag [#allocation3], %s103_s22  ;;  %s416_s3 = scalar_lea.hbm %s611_s27, 1024 }
  0x17   : > { %p417_p3 = scmp.ne.s32.totalorder %s611_s27, %s416_s3  ;;  %p418_p5 = pneg %p617_p0 }
  0x18   : > { %s421_s12 = scalar_lea.hbm %s718_s0, 2048  ;;  %p422_p4 = scmp.lt.u32.totalorder %s611_s27, %s718_s0 }
  0x19   : > { %p419_p6 = pnand %p418_p5, %p417_p3  ;;  %p423_p10 = scmp.lt.u32.totalorder %s421_s12, %s416_s3 }
  0x1a   : > { %p425_p12 = scmp.lt.u32.totalorder %s416_s3, %s611_s27 }
  0x1b   : > { %p420_p7 = pneg %p419_p6  ;;  %p424_p13 = por %p423_p10, %p422_p4 }
  0x1d   : > { %p426_p1 = por %p425_p12, %p424_p13 }
  0x1f   : > { %p427_p2 = pnand %p426_p1, %p420_p7 }
  0x21   : > { %430 = shalt.err (!%p427_p2)
}
  0x22   : > { %s431_s16 = scalar_lea.vmem %s613_s29, 1024  ;;  %s530_s17 = smov [#allocation2]  }
  0x23   : > { %p432_p3 = scmp.ne.s32.totalorder %s613_s29, %s431_s16  ;;  %s436_s22 = sshll.u32 %s530_s17, 4  ;;  %s437_s22 = int_to_ptr.vmem [resolvable:$false] %s436_s22 }
  0x24   : > { %s438_s23 = scalar_lea.vmem %s437_s22, 2048  ;;  %p439_p9 = scmp.lt.s32.totalorder %s613_s29, %s437_s22 }
  0x25   : > { %p434_p6 = pnand %p432_p3, %p418_p5  ;;  %p440_p4 = scmp.lt.s32.totalorder %s438_s23, %s431_s16 }
  0x27   : > { %p435_p11 = pneg %p434_p6  ;;  %p441_p10 = por %p440_p4, %p439_p9 }
  0x29   : > { %p442_p12 = pnand %p441_p10, %p435_p11 }
  0x2b   : > { %445 = shalt.err (!%p442_p12)
}
  0x2c   : > { %343 = dma.hbm_to_vmem [thread:$0]  (!%p617_p0), %s611_s27, 1024, %s613_s29, %s104_s2  }
  0x2d   : > { %p726_p1 = scmp.lt.s32.totalorder %s528_s11, 3  ;;  %p727_p2 = scmp.ge.s32.totalorder %s528_s11, 1 }
  0x2f   : > { %p123_p5 = pnand %p727_p2, %p726_p1 }
  0x30   : > { %s653_s24 = sand.u32 (!%p123_p5), 1, %s512_s7  }
  0x31   : > { %126 = sbr.rel (%p123_p5) target bundleno = 410 (0x19a), region = 24  ;;  %s327_s25 = sshll.u32 (!%p123_p5), %s653_s24, 6 }
  0x32   : > { %s129_s26 = scalar_lea.sflag (!%p123_p5), [#allocation3], %s653_s24  ;;  %s132_s28 = scalar_lea.vmem (!%p123_p5), [#allocation2], %s327_s25 }
  0x38   : > { %499 = dma.done.wait (%p589_p8), %s129_s26, 1024  }
  0x39   : > { %501 = vsyncadd (%p589_p8), %s129_s26, 4294966272  ;;  %v151_v0 = vld [vmem:[%s132_s28] sm:$0xff]  ;;  %v152_v1 = vld [vmem:[%s132_s28 + $0x8] sm:$0xff]  ;;  %s335_s18 = sshll.u32 %s520_s9, 10  ;;  %s150_s27 = scalar_lea.vmem [#allocation5], %s327_s25 }
  0x3a   : > { %v153_v2 = vld [vmem:[%s132_s28 + $0x10] sm:$0xff]  ;;  %v154_v3 = vld [vmem:[%s132_s28 + $0x18] sm:$0xff]  ;;  %v155_v4 = vld [vmem:[%s132_s28 + $0x20] sm:$0xff]  ;;  %s235_s29 = sshll.u32 %s150_s27, 4  ;;  %s669_s3 = scalar_lea.hbm %s719_s1, %s335_s18  ;;  %s671_s29 = int_to_ptr.vmem [resolvable:$true] %s235_s29 }
  0x3b   : > { %v156_v5 = vld [vmem:[%s132_s28 + $0x28] sm:$0xff]  ;;  %v157_v6 = vld [vmem:[%s132_s28 + $0x30] sm:$0xff]  ;;  %v158_v7 = vld [vmem:[%s132_s28 + $0x38] sm:$0xff]  ;;  %v159_v8 = vmax.f32 %v151_v0, %v155_v4  ;;  %s219_s9 = scalar_lea.sflag [#allocation4], %s653_s24  ;;  %s446_s4 = scalar_lea.vmem %s671_s29, 1024 }
  0x3c   : > { %v160_v9 = vmax.f32 %v152_v1, %v156_v5  ;;  %v161_v10 = vmax.f32 %v153_v2, %v157_v6  ;;  %v162_v11 = vmax.f32 %v154_v3, %v158_v7  ;;  %p447_p8 = scmp.ne.s32.totalorder %s671_s29, %s446_s4  ;;  %p728_p9 = scmp.ne.s32.totalorder %s723_s19, 0 }
  0x3d   : > { %s531_s5 = smov [#allocation5]  }
  0x3e   : > { %v163_v12 = vmax.f32 %v159_v8, %v160_v9  ;;  %v164_v13 = vmax.f32 %v161_v10, %v162_v11  ;;  %p448_p11 = pnand %p447_p8, %p728_p9  ;;  %s450_s12 = sshll.u32 %s531_s5, 4  ;;  %s451_s12 = int_to_ptr.vmem [resolvable:$false] %s450_s12 }
  0x3f   : > { %s452_s13 = scalar_lea.vmem %s451_s12, 2048  ;;  %p453_p7 = scmp.lt.s32.totalorder %s671_s29, %s451_s12 }
  0x40   : > { %v165_v14 = vmax.f32 %v163_v12, %v164_v13  ;;  %p449_p0 = pneg %p448_p11  ;;  %p454_p13 = scmp.lt.s32.totalorder %s452_s13, %s446_s4 }
  0x42   : > { %166 = vmax.xlane.f32.xlu0 %v165_v14  ;;  %p455_p3 = por %p454_p13, %p453_p7 }
  0x44   : > { %p456_p6 = pnand %p455_p3, %p449_p0 }
  0xcf   : > { %v167_v15 = vpop.xlane.xlu0 %166 }
  0xd0   : > { %v168_v16 = vsub.f32 %v151_v0, %v167_v15  ;;  %v169_v17 = vsub.f32 %v152_v1, %v167_v15  ;;  %v170_v18 = vsub.f32 %v153_v2, %v167_v15  ;;  %v171_v19 = vsub.f32 %v154_v3, %v167_v15 }
  0xd1   : > { %v172_v23 = vsub.f32 %v155_v4, %v167_v15  ;;  %v173_v25 = vsub.f32 %v156_v5, %v167_v15  ;;  %v174_v26 = vsub.f32 %v157_v6, %v167_v15  ;;  %v175_v28 = vsub.f32 %v158_v7, %v167_v15 }
  0xd2   : > { %v176_v20 = vmul.f32 1.442695, %v168_v16  ;;  %v178_v21 = vmul.f32 1.442695, %v169_v17  ;;  %v180_v22 = vmul.f32 1.442695, %v170_v18 }
  0xd3   : > { %v182_v24 = vmul.f32 1.442695, %v171_v19  ;;  %v184_v27 = vmul.f32 1.442695, %v172_v23  ;;  %v186_v29 = vmul.f32 1.442695, %v173_v25 }
  0xd4   : > { %398 = vpow2.f32 %v176_v20  ;;  %v188_v30 = vmul.f32 1.442695, %v174_v26  ;;  %v190_v31 = vmul.f32 1.442695, %v175_v28 }
  0xd5   : > { %400 = vpow2.f32 %v178_v21 }
  0xd6   : > { %402 = vpow2.f32 %v180_v22 }
  0xd7   : > { %404 = vpow2.f32 %v182_v24 }
  0xd8   : > { %406 = vpow2.f32 %v184_v27 }
  0xd9   : > { %408 = vpow2.f32 %v186_v29 }
  0xda   : > { %410 = vpow2.f32 %v188_v30 }
  0xdb   : > { %412 = vpow2.f32 %v190_v31 }
  0xde   : > { %v399_v32 = vpop.eup %398 }
  0xdf   : > { %v401_v33 = vpop.eup %400 }
  0xe0   : > { %v192_v34 = vadd.f32 %v401_v33, %v399_v32  ;;  %v403_v35 = vpop.eup %402 }
  0xe1   : > { %v405_v37 = vpop.eup %404 }
  0xe2   : > { %v193_v36 = vadd.f32 %v403_v35, %v192_v34  ;;  %v407_v39 = vpop.eup %406 }
  0xe3   : > { %v409_v41 = vpop.eup %408 }
  0xe4   : > { %v194_v38 = vadd.f32 %v405_v37, %v193_v36  ;;  %v411_v43 = vpop.eup %410 }
  0xe5   : > { %v413_v45 = vpop.eup %412 }
  0xe6   : > { %v195_v40 = vadd.f32 %v407_v39, %v194_v38 }
  0xe8   : > { %v196_v42 = vadd.f32 %v409_v41, %v195_v40 }
  0xea   : > { %v197_v44 = vadd.f32 %v411_v43, %v196_v42 }
  0xec   : > { %v198_v46 = vadd.f32 %v413_v45, %v197_v44 }
  0xee   : > { %199 = vadd.xlane.f32.xlu0 %v198_v46 }
 0x17b   : > { %v200_v47 = vpop.xlane.xlu0 %199 }
 0x17c   : > { %414 = vrcp.f32 %v200_v47 }
 0x186   : > { %v415_v48 = vpop.eup %414 }
 0x187   : > { %v202_v49 = vmul.f32 %v415_v48, %v399_v32  ;;  %v203_v50 = vmul.f32 %v415_v48, %v401_v33  ;;  %v204_v51 = vmul.f32 %v415_v48, %v403_v35  ;;  %v205_v52 = vmul.f32 %v415_v48, %v405_v37 }
 0x188   : > { %v206_v53 = vmul.f32 %v415_v48, %v407_v39  ;;  %v207_v54 = vmul.f32 %v415_v48, %v409_v41  ;;  %v208_v55 = vmul.f32 %v415_v48, %v411_v43  ;;  %v209_v56 = vmul.f32 %v415_v48, %v413_v45 }
 0x189   : > { %210 = vst [vmem:[%s150_s27] sm:$0xff] %v202_v49  ;;  %211 = vst [vmem:[%s150_s27 + $0x8] sm:$0xff] %v203_v50 }
 0x18a   : > { %212 = vst [vmem:[%s150_s27 + $0x10] sm:$0xff] %v204_v51  ;;  %213 = vst [vmem:[%s150_s27 + $0x18] sm:$0xff] %v205_v52 }
 0x18b   : > { %214 = vst [vmem:[%s150_s27 + $0x20] sm:$0xff] %v206_v53  ;;  %215 = vst [vmem:[%s150_s27 + $0x28] sm:$0xff] %v207_v54 }
 0x18c   : > { %216 = vst [vmem:[%s150_s27 + $0x30] sm:$0xff] %v208_v55  ;;  %217 = vst [vmem:[%s150_s27 + $0x38] sm:$0xff] %v209_v56 }
 0x18d   : > { %459 = shalt.err (!%p456_p6)
}
 0x18e   : > { %s460_s15 = scalar_lea.hbm %s669_s3, 1024  ;;  %s464_s22 = scalar_lea.hbm %s719_s1, 2048 }
 0x18f   : > { %p461_p4 = scmp.ne.s32.totalorder %s669_s3, %s460_s15  ;;  %p465_p1 = scmp.lt.u32.totalorder %s669_s3, %s719_s1 }
 0x190   : > { %p466_p2 = scmp.lt.u32.totalorder %s464_s22, %s460_s15  ;;  %p468_p8 = scmp.lt.u32.totalorder %s460_s15, %s669_s3 }
 0x191   : > { %p462_p10 = pnand %p461_p4, %p728_p9 }
 0x192   : > { %p467_p5 = por %p466_p2, %p465_p1 }
 0x193   : > { %p463_p12 = pneg %p462_p10 }
 0x194   : > { %p469_p11 = por %p468_p8, %p467_p5 }
 0x196   : > { %p470_p0 = pnand %p469_p11, %p463_p12 }
 0x198   : > { %473 = shalt.err (!%p470_p0)
}
 0x199   : > { %338 = dma.vmem_to_hbm [thread:$0]  (%p728_p9), %s671_s29, 1024, %s669_s3, %s219_s9  }
 0x19a PF: > { %s247_s25 = sand.u32 1, %s508_s6   ;;  %p729_p7 = scmp.ne.s32.totalorder %s724_s21, 0 }
 0x19b   : > { %p730_p13 = scmp.ge.s32.totalorder %s528_s11, 2  ;;  %s248_s26 = scalar_lea.sflag [#allocation4], %s247_s25 }
 0x19d   : > { %p345_p3 = pnand %p730_p13, %p729_p7 }
 0x19f   : > { %503 = dma.done.wait (!%p345_p3), %s248_s26, 1024  }
 0x1a0   : > { %505 = vsyncadd (!%p345_p3), %s248_s26, 4294966272  ;;  %s17_s11 = sadd.s32 1, %s528_s11   ;;  %s731_s6 = smov %s512_s7 }
 0x1a1   : > { %p14_p6 = scmp.ge.s32.totalorder %s17_s11, 4   ;;  %s732_s7 = smov %s516_s8 }
 0x1a2   : > { %s733_s8 = smov %s598_s20  ;;  %s734_s9 = smov %s524_s10 }
 0x1a3   : > { %s735_s10 = smov %s737_s14  ;;  %16 = sbr.rel (!%p14_p6) target bundleno = 6 (0x6), region = 69 }
 0x1aa   :  { %253 = vsyncpa [#allocation3], 1 }
 0x1ab   :  { %255 = vsyncpa [#allocation3 + $0x1], 1 }
 0x1ac   :  { %256 = vsyncpa [#allocation4], 1 }
 0x1ad   :  { %258 = vsyncpa [#allocation4 + $0x1], 1 }

</bundles_post_ra>
